<compile_context>
chip_gen: v5e
topology: v5e:2x2
jax: 0.10.0
libtpu: 0.0.40
codegen_flags: <defaults>
</compile_context>

<pallas_src>
import jax
import jax.numpy as jnp
import numpy as np
from jax.experimental import pallas as pl
from jax.experimental.pallas import tpu as pltpu

_MAX_TILE_M = 512  # output-row tile; N_pad padded to a multiple of this (and of 128)


def _round_up(x, m):
    return (x + m - 1) // m * m


def _pad_sizes(n):
    """Return (n_pad, tile_m): lane-padded box count and output-row tile size."""
    n128 = _round_up(max(int(n), 1), 128)
    if n128 <= _MAX_TILE_M:
        return n128, n128
    return _round_up(n128, _MAX_TILE_M), _MAX_TILE_M


def _select_kernel(nv_ref, dest_ref, payload_ref, out_ref):
    """One (tile_m, p_pad) output tile of the compaction: out = one_hot(dest) @ payload.

    nv_ref      : (B,) int32 SMEM scalar-prefetch  -- num_valid per image
    dest_ref    : (1, n_pad) int32                 -- dest row of each box (-1 = invalid/pad)
    payload_ref : (n_pad, p_pad) f32               -- [boxes|landmarks|area|labels|iscrowd|0pad]
    out_ref     : (tile_m, p_pad) f32              -- compacted rows for this tile
    """
    b = pl.program_id(0)
    step = pl.program_id(1)
    tile_m = out_ref.shape[0]
    n_pad = payload_ref.shape[0]
    row0 = step * tile_m
    nv = nv_ref[b]

    # Tail-tile skip: every row >= num_valid is all-zero by construction.
    @pl.when(row0 < nv)
    def _():
        # (1, n_pad) subtract instead of adding step*tile_m to a (tile_m, n_pad) iota.
        d = dest_ref[...] - row0
        row = jax.lax.broadcasted_iota(jnp.int32, (tile_m, n_pad), 0)
        gmat = (row == d).astype(jnp.float32)          # one-hot selection rows
        out_ref[...] = jnp.dot(gmat, payload_ref[...],
                               preferred_element_type=jnp.float32)

    @pl.when(row0 >= nv)
    def _():
        out_ref[...] = jnp.zeros_like(out_ref)


def _compact_select(payload, dest, num_valid, *, tile_m):
    """payload (B, n_pad, p_pad) f32, dest (B, 1, n_pad) i32, num_valid (B,) i32."""
    B, n_pad, p_pad = payload.shape
    n_tiles = n_pad // tile_m
    # Rough resident footprint (double-buffered inputs + output tile); raise the
    # scoped-VMEM limit for large N (matters on v5e's 16 MiB default).
    resident = (n_pad * p_pad * 4 + n_pad * 4) * 2 + tile_m * p_pad * 4 * 2
    vmem_limit = int(min(100 << 20, max(32 << 20, 2 * resident)))

    return pl.pallas_call(
        _select_kernel,
        out_shape=jax.ShapeDtypeStruct((B, n_pad, p_pad), jnp.float32),
        grid_spec=pltpu.PrefetchScalarGridSpec(
            num_scalar_prefetch=1,                       # num_valid -> SMEM
            grid=(B, n_tiles),
            in_specs=[
                pl.BlockSpec((None, 1, n_pad), lambda b, i, nv: (b, 0, 0)),
                pl.BlockSpec((None, n_pad, p_pad), lambda b, i, nv: (b, 0, 0)),
            ],
            out_specs=pl.BlockSpec((None, tile_m, p_pad), lambda b, i, nv: (b, i, 0)),
        ),
        compiler_params=pltpu.CompilerParams(
            dimension_semantics=("parallel", "parallel"),
            vmem_limit_bytes=vmem_limit),
    )(num_valid, dest, payload)


def _sanitize_batched(boxes, landmarks, labels, area, iscrowd, min_size, max_size):
    """All inputs carry a leading batch dim B; boxes is (B, N, 4) cxcywh."""
    B, n = boxes.shape[0], boxes.shape[1]
    lnd = landmarks.shape[-1]
    n_pad, tile_m = _pad_sizes(n)
    p = 4 + lnd + 3
    p_pad = _round_up(p, 128)

    boxes = boxes.astype(jnp.float32)
    cx, cy, w, h = boxes[..., 0], boxes[..., 1], boxes[..., 2], boxes[..., 3]
    # O(N) validity / scan hoisted out of the kernel (enables fully parallel grid).
    valid = ((w >= min_size) & (h >= min_size) &
             (w <= max_size) & (h <= max_size) &
             (cx >= 0.0) & (cx <= 1.0) & (cy >= 0.0) & (cy <= 1.0))        # (B, N)
    csum = jnp.cumsum(valid.astype(jnp.int32), axis=-1)                    # (B, N)
    dest = jnp.where(valid, csum - 1, -1)                                  # (B, N)
    num_valid = csum[:, -1].astype(jnp.int32)                              # (B,)
    dest_pad = jnp.pad(dest, ((0, 0), (0, n_pad - n)),
                       constant_values=-1)[:, None, :]                     # (B, 1, n_pad)

    # Fused payload slab built with ONE concatenate + ONE pad.
    # TODO(synk): PyTorch labels/iscrowd are int64; the f32 payload round-trip is
    # exact only for |value| < 2^24.
    payload = jnp.concatenate([
        boxes,
        landmarks.astype(jnp.float32),
        area.astype(jnp.float32)[..., None],
        labels.astype(jnp.float32)[..., None],
        iscrowd.astype(jnp.float32)[..., None],
    ], axis=-1)                                                            # (B, N, p)
    payload = jnp.pad(payload, ((0, 0), (0, n_pad - n), (0, p_pad - p)))   # (B, n_pad, p_pad)

    slab = _compact_select(payload, dest_pad, num_valid, tile_m=tile_m)
    return slab, valid.astype(jnp.int32), num_valid


def _build_new_target(target, slab_n, lnd):
    new_target = dict(target)
    new_target['boxes'] = slab_n[..., 0:4]
    if 'landmarks' in target:
        new_target['landmarks'] = slab_n[..., 4:4 + lnd]
    if 'area' in target:
        new_target['area'] = slab_n[..., 4 + lnd]
    if 'labels' in target:
        new_target['labels'] = jnp.round(slab_n[..., 5 + lnd]).astype(jnp.int32)
    if 'iscrowd' in target:
        new_target['iscrowd'] = jnp.round(slab_n[..., 6 + lnd]).astype(jnp.int32)
    return new_target


def strict_sanitize_bounding_box(img, target=None, *, min_size=0.01, max_size=1.0,
                                 remove_invalid=True):
    """Forward pass of StrictSanitizeBoundingBox for a single image/target."""
    if target is None or 'boxes' not in target:
        return img, target
    boxes = target['boxes']
    if boxes.size == 0:
        return img, target
    if not remove_invalid or boxes.shape[-1] != 4:
        return img, target

    n = boxes.shape[0]
    landmarks = target.get('landmarks', jnp.zeros((n, 10), jnp.float32))
    labels = target.get('labels', jnp.zeros((n,), jnp.int32))
    area = target.get('area', jnp.zeros((n,), jnp.float32))
    iscrowd = target.get('iscrowd', jnp.zeros((n,), jnp.int32))
    lnd = landmarks.shape[-1]

    slab, valid, num_valid = _sanitize_batched(
        boxes[None], landmarks[None], labels[None], area[None], iscrowd[None],
        min_size, max_size)

    # TODO(synk): torch boolean indexing yields a dynamic first dim; JAX requires
    # static shapes, so outputs are compacted to the front and zero-padded, with
    # 'num_valid' giving the logical length.
    new_target = _build_new_target(target, slab[0, :n], lnd)
    new_target['valid_mask'] = valid[0]
    new_target['num_valid'] = num_valid[0]
    return img, new_target


def strict_sanitize_bounding_box_batched(imgs, targets=None, *, min_size=0.01,
                                         max_size=1.0, remove_invalid=True):
    """Batched forward: every value in `targets` carries a leading batch dim B
    (same padded box count N per image). One pallas_call serves all B targets."""
    if targets is None or 'boxes' not in targets:
        return imgs, targets
    boxes = targets['boxes']
    if boxes.size == 0:
        return imgs, targets
    if not remove_invalid or boxes.shape[-1] != 4:
        return imgs, targets

    B, n = boxes.shape[0], boxes.shape[1]
    landmarks = targets.get('landmarks', jnp.zeros((B, n, 10), jnp.float32))
    labels = targets.get('labels', jnp.zeros((B, n), jnp.int32))
    area = targets.get('area', jnp.zeros((B, n), jnp.float32))
    iscrowd = targets.get('iscrowd', jnp.zeros((B, n), jnp.int32))
    lnd = landmarks.shape[-1]

    slab, valid, num_valid = _sanitize_batched(
        boxes, landmarks, labels, area, iscrowd, min_size, max_size)

    new_targets = _build_new_target(targets, slab[:, :n], lnd)
    new_targets['valid_mask'] = valid
    new_targets['num_valid'] = num_valid
    return imgs, new_targets


if __name__ == "__main__":
    key = jax.random.PRNGKey(0)
    k1, k2, k3, k4 = jax.random.split(key, 4)

    B, N = 2, 8
    imgs = jax.random.normal(k1, (B, 3, 16, 16), dtype=jnp.float32)
    # cxcywh boxes, intentionally including out-of-range / degenerate ones
    boxes = jax.random.uniform(k2, (B, N, 4), minval=-0.05, maxval=1.05,
                               dtype=jnp.float32)
    landmarks = jax.random.normal(k3, (B, N, 10), dtype=jnp.float32)
    labels = jax.random.randint(k4, (B, N), 0, 5).astype(jnp.int32)
    area = boxes[..., 2] * boxes[..., 3]
    iscrowd = jnp.zeros((B, N), jnp.int32)

    targets = {'boxes': boxes, 'landmarks': landmarks, 'labels': labels,
               'area': area, 'iscrowd': iscrowd}

    # --- batched path: B targets through one pallas_call ---
    _, tgts_out = strict_sanitize_bounding_box_batched(imgs, targets)
    jax.block_until_ready(tgts_out['boxes'])

    # --- single-image path (B=1 internally), image 0 ---
    tgt0 = {k: v[0] for k, v in targets.items()}
    _, tgt0_out = strict_sanitize_bounding_box(imgs[0], tgt0)
    jax.block_until_ready(tgt0_out['boxes'])

    # Pure-numpy reference (same semantics, static compaction convention).
    bnp = np.asarray(boxes)
    lmnp = np.asarray(landmarks)
    lbnp = np.asarray(labels)
    arnp = np.asarray(area)
    for bidx in range(B):
        cx, cy, w, h = bnp[bidx, :, 0], bnp[bidx, :, 1], bnp[bidx, :, 2], bnp[bidx, :, 3]
        valid = ((w >= 0.01) & (h >= 0.01) & (w <= 1.0) & (h <= 1.0) &
                 (cx >= 0) & (cx <= 1) & (cy >= 0) & (cy <= 1))
        nv = int(valid.sum())
        ref_boxes = np.zeros((N, 4), np.float32); ref_boxes[:nv] = bnp[bidx][valid]
        ref_lm = np.zeros((N, 10), np.float32);   ref_lm[:nv] = lmnp[bidx][valid]
        ref_labels = np.zeros((N,), np.int32);    ref_labels[:nv] = lbnp[bidx][valid]
        ref_area = np.zeros((N,), np.float32);    ref_area[:nv] = arnp[bidx][valid]

        assert int(tgts_out['num_valid'][bidx]) == nv
        np.testing.assert_allclose(np.asarray(tgts_out['boxes'][bidx]), ref_boxes,
                                   rtol=0, atol=1e-5)
        np.testing.assert_allclose(np.asarray(tgts_out['landmarks'][bidx]), ref_lm,
                                   rtol=0, atol=1e-5)
        np.testing.assert_allclose(np.asarray(tgts_out['area'][bidx]), ref_area,
                                   rtol=0, atol=1e-5)
        np.testing.assert_array_equal(np.asarray(tgts_out['labels'][bidx]), ref_labels)
        np.testing.assert_array_equal(np.asarray(tgts_out['valid_mask'][bidx]),
                                      valid.astype(np.int32))

        if bidx == 0:
            assert int(tgt0_out['num_valid']) == nv
            np.testing.assert_allclose(np.asarray(tgt0_out['boxes']), ref_boxes,
                                       rtol=0, atol=1e-5)
            np.testing.assert_allclose(np.asarray(tgt0_out['landmarks']), ref_lm,
                                       rtol=0, atol=1e-5)
            np.testing.assert_allclose(np.asarray(tgt0_out['area']), ref_area,
                                       rtol=0, atol=1e-5)
            np.testing.assert_array_equal(np.asarray(tgt0_out['labels']), ref_labels)
            np.testing.assert_array_equal(np.asarray(tgt0_out['valid_mask']),
                                          valid.astype(np.int32))

    print("KERNEL_OK")
</pallas_src>

<mosaic_0001>
module attributes {stable_mosaic.version = 11 : i64} {
  func.func @_select_kernel(%arg0: i32, %arg1: i32, %arg2: memref<2xi32, #tpu.memory_space<smem>>, %arg3: memref<1x1x128xi32, #tpu.memory_space<vmem>>, %arg4: memref<1x128x128xf32, #tpu.memory_space<vmem>>, %arg5: memref<1x128x128xf32, #tpu.memory_space<vmem>>) attributes {dimension_semantics = [#tpu.dimension_semantics<parallel>, #tpu.dimension_semantics<parallel>], iteration_bounds = array<i64: 2, 1>, scalar_prefetch = 1 : i64, scratch_operands = 0 : i64, tpu.core_type = #tpu.core_type<tc>, window_params = [{transform_indices = @transform_0, window_bounds = array<i64: 1, 1, 128>}, {transform_indices = @transform_1, window_bounds = array<i64: 1, 128, 128>}, {transform_indices = @transform_2, window_bounds = array<i64: 1, 128, 128>}]} {
    %c128_i32 = arith.constant 128 : i32
    %0 = arith.muli %arg1, %c128_i32 : i32
    %1 = arith.index_cast %arg0 : i32 to index
    %2 = memref.load %arg2[%1] : memref<2xi32, #tpu.memory_space<smem>>
    %3 = arith.cmpi slt, %0, %2 : i32
    %4 = arith.extui %3 : i1 to i32
    %c0_i32 = arith.constant 0 : i32
    %5 = arith.cmpi ne, %4, %c0_i32 : i32
    scf.if %5 {
      %c0 = arith.constant 0 : index
      %c0_1 = arith.constant 0 : index
      %c0_2 = arith.constant 0 : index
      %9 = vector.load %arg3[%c0, %c0_1, %c0_2] : memref<1x1x128xi32, #tpu.memory_space<vmem>>, vector<1x1x128xi32>
      %10 = vector.shape_cast %9 : vector<1x1x128xi32> to vector<1x128xi32>
      %11 = vector.broadcast %0 : i32 to vector<1x128xi32>
      %12 = arith.subi %10, %11 : vector<1x128xi32>
      %13 = tpu.iota {dimensions = array<i32: 0>} : vector<128x128xi32>
      %14 = vector.broadcast %12 : vector<1x128xi32> to vector<128x128xi32>
      %15 = arith.cmpi eq, %13, %14 : vector<128x128xi32>
      %16 = arith.extui %15 : vector<128x128xi1> to vector<128x128xi32>
      %17 = arith.sitofp %16 : vector<128x128xi32> to vector<128x128xf32>
      %c0_3 = arith.constant 0 : index
      %c0_4 = arith.constant 0 : index
      %c0_5 = arith.constant 0 : index
      %18 = vector.load %arg4[%c0_3, %c0_4, %c0_5] : memref<1x128x128xf32, #tpu.memory_space<vmem>>, vector<1x128x128xf32>
      %19 = vector.shape_cast %18 : vector<1x128x128xf32> to vector<128x128xf32>
      %cst = arith.constant dense<0.000000e+00> : vector<128x128xf32>
      %20 = tpu.matmul %17, %19, %cst {dimension_numbers = #tpu.dot_dimension_numbers<[1], [0], [0], [1], [0, 0, 1, 1], [], []>} : vector<128x128xf32>, vector<128x128xf32>, vector<128x128xf32> -> vector<128x128xf32>
      %c0_6 = arith.constant 0 : index
      %c0_7 = arith.constant 0 : index
      %c0_8 = arith.constant 0 : index
      %21 = vector.load %arg5[%c0_6, %c0_7, %c0_8] : memref<1x128x128xf32, #tpu.memory_space<vmem>>, vector<1x128x128xf32>
      %22 = vector.shape_cast %21 : vector<1x128x128xf32> to vector<128x128xf32>
      %23 = vector.shape_cast %20 : vector<128x128xf32> to vector<1x128x128xf32>
      tpu.vector_store %arg5[%c0_6, %c0_7, %c0_8], %23 {strides = array<i32>} : memref<1x128x128xf32, #tpu.memory_space<vmem>>, vector<1x128x128xf32>,
    } else {
    }
    %6 = arith.cmpi sge, %0, %2 : i32
    %7 = arith.extui %6 : i1 to i32
    %c0_i32_0 = arith.constant 0 : i32
    %8 = arith.cmpi ne, %7, %c0_i32_0 : i32
    scf.if %8 {
      %cst = arith.constant 0.000000e+00 : f32
      %9 = vector.broadcast %cst : f32 to vector<128x128xf32>
      %c0 = arith.constant 0 : index
      %c0_1 = arith.constant 0 : index
      %c0_2 = arith.constant 0 : index
      %10 = vector.load %arg5[%c0, %c0_1, %c0_2] : memref<1x128x128xf32, #tpu.memory_space<vmem>>, vector<1x128x128xf32>
      %11 = vector.shape_cast %10 : vector<1x128x128xf32> to vector<128x128xf32>
      %12 = vector.shape_cast %9 : vector<128x128xf32> to vector<1x128x128xf32>
      tpu.vector_store %arg5[%c0, %c0_1, %c0_2], %12 {strides = array<i32>} : memref<1x128x128xf32, #tpu.memory_space<vmem>>, vector<1x128x128xf32>,
    } else {
    }
    return
  }
  func.func @transform_0(%arg0: i32, %arg1: i32, %arg2: memref<2xi32, #tpu.memory_space<smem>>) -> (i32, i32, i32) {
    %c0_i32 = arith.constant 0 : i32
    %c0_i32_0 = arith.constant 0 : i32
    %c0_i32_1 = arith.constant 0 : i32
    return %arg0, %c0_i32, %c0_i32_0 : i32, i32, i32
  }
  func.func @transform_1(%arg0: i32, %arg1: i32, %arg2: memref<2xi32, #tpu.memory_space<smem>>) -> (i32, i32, i32) {
    %c0_i32 = arith.constant 0 : i32
    %c0_i32_0 = arith.constant 0 : i32
    %c0_i32_1 = arith.constant 0 : i32
    return %arg0, %c0_i32, %c0_i32_0 : i32, i32, i32
  }
  func.func @transform_2(%arg0: i32, %arg1: i32, %arg2: memref<2xi32, #tpu.memory_space<smem>>) -> (i32, i32, i32) {
    %c0_i32 = arith.constant 0 : i32
    %c0_i32_0 = arith.constant 0 : i32
    return %arg0, %arg1, %c0_i32 : i32, i32, i32
  }
}

</mosaic_0001>

<bundles_post_ra>
// kernel: tpu_custom_call.1
= control target key start
LH: loop header
LB: loop body
LE: loop exit
PB: predicated region body
PF: predicated region fallthrough
CT: control target
= control target key end

     0   :  { %s874_s15 = smov [#allocation3]   ;;  %s1144_s0 = inlined_call_operand.hbm [shape: s32[2], index: 0, kind: input, shape index: {}]   ;;  %s1145_s1 = inlined_call_operand.hbm [shape: s32[2,1,128], index: 1, kind: input, shape index: {}]   ;;  %s1146_s2 = inlined_call_operand.hbm [shape: f32[2,128,128], index: 2, kind: input, shape index: {}]   ;;  %s1147_s3 = inlined_call_operand.hbm [shape: f32[2,128,128], index: 3, kind: output, shape index: {}]  }
   0x1   :  { %s9_s14 = sshll.u32 %s1144_s0, 4  ;;  %s10_s14 = int_to_ptr.hbm [resolvable:$true] %s9_s14 }
   0x2   :  { %12 = dma.hbm_to_smem %s10_s14, 16, %s874_s15, [#allocation2] }
   0x3   :  { %836 = dma.done.wait [#allocation2], 16 }
   0x4   :  { %837 = vsyncadd [#allocation2], 4294967280 }
   0x5   :  { %15 = sfence }
   0x6   :  { %16 = vsyncpa [#allocation5], 0 }
   0x7   :  { %18 = vsyncpa [#allocation5 + $0x1], 0 }
   0x8   :  { %19 = vsyncpa [#allocation8], 0 }
   0x9   :  { %21 = vsyncpa [#allocation8 + $0x1], 0 }
   0xa   :  { %22 = vsyncpa [#allocation6], 0 }
   0xb   :  { %24 = vsyncpa [#allocation6 + $0x1], 0  ;;  %s904_s16 = smov 0   ;;  %s906_s17 = smov 0  }
   0xc   :  { %s908_s18 = smov 0   ;;  %s910_s19 = smov 0  }
   0xd   :  { %s912_s0 = smov 0   ;;  %s914_s20 = smov 0  }
   0xe LB: > { %s536_s21 = sadd.s32 4294967295, %s872_s20   ;;  %s537_s22 = sadd.s32 4294967294, %s872_s20   ;;  %s872_s20 = sphi %s914_s20, %s30_s20   ;;  %s868_s0 = sphi %s912_s0, %s1157_s0   ;;  %s864_s19 = sphi %s910_s19, %s1156_s19   ;;  %s860_s18 = sphi %s908_s18, %s1155_s18   ;;  %s856_s17 = sphi %s906_s17, %s1154_s17   ;;  %s852_s16 = sphi %s904_s16, %s1153_s16  }
   0xf   : > { %s42_s23 = sadd.s32 1, %s868_s0  ;;  %s49_s24 = sadd.s32 1, %s860_s18 }
  0x10   : > { %p44_p0 = scmp.ge.s32.totalorder %s42_s23, 2  ;;  %p56_p1 = scmp.ne.s32.totalorder %s860_s18, %s856_s17 }
  0x11   : > { %p57_p2 = scmp.eq.s32.totalorder %s872_s20, 0  ;;  %p62_p3 = scmp.ne.s32.totalorder %s856_s17, %s852_s16 }
  0x12   : > { %s1159_s23 = smov (%p44_p0, %s42_s23), 0  ;;  %p63_p5 = scmp.eq.s32.totalorder %s536_s21, 0 }
  0x13   : > { %p945_p4 = por %p57_p2, %p56_p1  ;;  %s46_s26 = ssub.s32 %s868_s0, %s1159_s23 }
  0x14   : > { %p114_p6 = scmp.eq.s32.totalorder %s536_s21, 1  ;;  %p47_p7 = scmp.eq.s32.totalorder %s46_s26, 0 }
  0x15   : > { %p951_p8 = por %p63_p5, %p62_p3  ;;  %p120_p10 = scmp.eq.s32.totalorder %s537_s22, 1 }
  0x16   : > { %p955_p9 = por %p114_p6, %p56_p1  ;;  %p539_p12 = scmp.ge.s32.totalorder %s872_s20, 2 }
  0x17   : > { %s960_s29 = scalar_select %p47_p7, %s860_s18, %s49_s24  }
  0x18   : > { %p962_p11 = por %p120_p10, %p62_p3  ;;  %p654_p13 = scmp.lt.s32.totalorder %s872_s20, 2 }
  0x19   : > { %s969_s4 = sand.u32 1, %s860_s18   ;;  %s146_s7 = scalar_lea.hbm %s1145_s1, %s868_s0 }
  0x1a   : > { %s143_s8 = scalar_lea.vmem [#allocation4], %s969_s4  ;;  %s148_s10 = sshll.u32 %s146_s7, 4  ;;  %s149_s10 = int_to_ptr.hbm [resolvable:$true] %s148_s10 }
  0x1b   : > { %s150_s9 = sshll.u32 %s143_s8, 4  ;;  %p978_p0 = pnand %p654_p13, %p945_p4  ;;  %s151_s9 = int_to_ptr.vmem [resolvable:$true] %s150_s9 }
  0x1c   : > { %p543_p1 = scmp.ge.s32.totalorder %s872_s20, 1  ;;  %p177_p2 = scmp.lt.s32.totalorder %s872_s20, 3 }
  0x1d   : > { %s141_s12 = scalar_lea.sflag [#allocation5], %s969_s4  ;;  %s540_s13 = sshll.u32 %s969_s4, 7 }
  0x1e   : > { %646 = dma.hbm_to_vmem [thread:$0]  (!%p978_p0), %s149_s10, 16, %s151_s9, %s141_s12  }
  0x1f   : > { %p178_p3 = pnand %p543_p1, %p177_p2  ;;  %s587_s14 = sshll.u32 %s868_s0, 7 }
  0x20   : > { %s166_s22 = scalar_lea.hbm %s1146_s2, %s587_s14  ;;  %s161_s24 = scalar_lea.vmem [#allocation7], %s540_s13 }
  0x21   : > { %s169_s25 = sshll.u32 %s161_s24, 4  ;;  %s167_s26 = sshll.u32 %s166_s22, 4  ;;  %s170_s25 = int_to_ptr.vmem [resolvable:$true] %s169_s25  ;;  %s168_s26 = int_to_ptr.hbm [resolvable:$true] %s167_s26 }
  0x22   : > { %s158_s5 = scalar_lea.sflag [#allocation8], %s969_s4  ;;  %s875_s6 = smov 128  }
  0x23   : > { %s876_s7 = smov 8   ;;  %181 = sbr.rel (%p178_p3) target bundleno = 287 (0x11f), region = 28 }
  0x24   : > { %649 = dma.hbm_to_vmem [thread:$0]  (!%p978_p0), %s168_s26, 2048, %s170_s25, %s158_s5, %s875_s6, %s875_s6, %s876_s7  }
  0x25   : > { %s996_s8 = sand.u32 (!%p178_p3), 1, %s856_s17  }
  0x26   : > { %s184_s9 = scalar_lea.sflag (!%p178_p3), [#allocation5], %s996_s8  ;;  %s186_s10 = scalar_lea.vmem (!%p178_p3), [#allocation4], %s996_s8 }
  0x28   : > { %839 = dma.done.wait (%p951_p8), %s184_s9, 16  }
  0x29   : > { %841 = vsyncadd (%p951_p8), %s184_s9, 4294967280  ;;  %s544_s4 = sshll.u32 %s996_s8, 7  ;;  %s193_s11 = scalar_lea.sflag [#allocation8], %s996_s8 }
  0x2a   : > { %s1006_s12 = scalar_lea.vmem [#allocation7], %s544_s4 }
  0x2b   : > { %843 = dma.done.wait (%p951_p8), %s193_s11, 2048  }
  0x2c   : > { %845 = vsyncadd (%p951_p8), %s193_s11, 4294965248  ;;  %s1013_s13 = sld [smem:[#allocation3 + %s864_s19]]  ;;  %s1015_s14 = scalar_lea.vmem [#allocation9], %s544_s4 }
  0x32   : > { %p547_p4 = scmp.le.s32.totalorder %s1013_s13, 0 }
  0x34   : > { %228 = sbr.rel (%p547_p4) target bundleno = 247 (0xf7), region = 40 }
  0x39   : > { %v313_v0 = vld [vmem:[%s1006_s12 + $0x78] sm:$0xff]  ;;  %v312_v1 = vld [vmem:[%s1006_s12 + $0x70] sm:$0xff]  ;;  %v311_v2 = vld [vmem:[%s1006_s12 + $0x68] sm:$0xff]  ;;  %v232_v10 = vlaneseq  ;;  %v877_v22 = vmov 1.0  }
  0x3a   : > { %590 = vmatpush.msra.mxu2 %v313_v0  ;;  %591 = vmatpush.msra.mxu3 %v313_v0  ;;  %v310_v3 = vld [vmem:[%s1006_s12 + $0x60] sm:$0xff]  ;;  %v309_v4 = vld [vmem:[%s1006_s12 + $0x58] sm:$0xff]  ;;  %v308_v5 = vld [vmem:[%s1006_s12 + $0x50] sm:$0xff] }
  0x3b   : > { %314 = vmatpush.msra.mxu0 %v313_v0  ;;  %589 = vmatpush.msra.mxu1 %v313_v0  ;;  %v307_v6 = vld [vmem:[%s1006_s12 + $0x48] sm:$0xff]  ;;  %v306_v7 = vld [vmem:[%s1006_s12 + $0x40] sm:$0xff]  ;;  %v305_v8 = vld [vmem:[%s1006_s12 + $0x38] sm:$0xff]  ;;  %v1030_v13 = vshrl.u32 %v232_v10, 7 }
  0x3c   : > { %593 = vmatpush.msra.mxu2 %v312_v1  ;;  %594 = vmatpush.msra.mxu3 %v312_v1  ;;  %v304_v9 = vld [vmem:[%s1006_s12 + $0x30] sm:$0xff]  ;;  %v303_v11 = vld [vmem:[%s1006_s12 + $0x28] sm:$0xff]  ;;  %v302_v12 = vld [vmem:[%s1006_s12 + $0x20] sm:$0xff] }
  0x3d   : > { %315 = vmatpush.msra.mxu0 %v312_v1  ;;  %592 = vmatpush.msra.mxu1 %v312_v1  ;;  %v301_v14 = vld [vmem:[%s1006_s12 + $0x18] sm:$0xff]  ;;  %v300_v15 = vld [vmem:[%s1006_s12 + $0x10] sm:$0xff]  ;;  %v241_v16 = vadd.s32 64, %v1030_v13  ;;  %v245_v18 = vadd.s32 96, %v1030_v13  ;;  %v299_v19 = vld [vmem:[%s1006_s12 + $0x8] sm:$0xff]  ;;  %v237_v20 = vadd.s32 32, %v1030_v13 }
  0x3e   : > { %596 = vmatpush.msra.mxu2 %v311_v2  ;;  %597 = vmatpush.msra.mxu3 %v311_v2  ;;  %v1037_v17 = vld [vmem:[%s186_s10] ss:$0 sm:$0xff]  ;;  %v298_v21 = vld [vmem:[%s1006_s12] sm:$0xff]  ;;  %v242_v23 = vadd.s32 72, %v1030_v13  ;;  %v246_v24 = vadd.s32 104, %v1030_v13  ;;  %v234_v25 = vadd.s32 8, %v1030_v13 }
  0x3f   : > { %316 = vmatpush.msra.mxu0 %v311_v2  ;;  %595 = vmatpush.msra.mxu1 %v311_v2  ;;  %vm258_vm0 = vcmp.eq.s32.totalorder %v241_v16, %v1037_v17  ;;  %vm262_vm1 = vcmp.eq.s32.totalorder %v245_v18, %v1037_v17  ;;  %vm250_vm2 = vcmp.eq.s32.totalorder %v1030_v13, %v1037_v17  ;;  %v238_v26 = vadd.s32 40, %v1030_v13 }
  0x40   : > { %599 = vmatpush.msra.mxu2 %v310_v3  ;;  %600 = vmatpush.msra.mxu3 %v310_v3  ;;  %vm254_vm3 = vcmp.eq.s32.totalorder %v237_v20, %v1037_v17  ;;  %vm259_vm4 = vcmp.eq.s32.totalorder %v242_v23, %v1037_v17  ;;  %vm263_vm5 = vcmp.eq.s32.totalorder %v246_v24, %v1037_v17  ;;  %v243_v27 = vadd.s32 80, %v1030_v13 }
  0x41   : > { %317 = vmatpush.msra.mxu0 %v310_v3  ;;  %598 = vmatpush.msra.mxu1 %v310_v3  ;;  %vm251_vm6 = vcmp.eq.s32.totalorder %v234_v25, %v1037_v17  ;;  %vm255_vm7 = vcmp.eq.s32.totalorder %v238_v26, %v1037_v17  ;;  %v247_v28 = vadd.s32 112, %v1030_v13  ;;  %v235_v29 = vadd.s32 16, %v1030_v13 }
  0x42   : > { %602 = vmatpush.msra.mxu2 %v309_v4  ;;  %603 = vmatpush.msra.mxu3 %v309_v4  ;;  %v239_v30 = vadd.s32 48, %v1030_v13  ;;  %vm260_vm8 = vcmp.eq.s32.totalorder %v243_v27, %v1037_v17  ;;  %v244_v31 = vadd.s32 88, %v1030_v13  ;;  %v248_v32 = vadd.s32 120, %v1030_v13 }
  0x43   : > { %318 = vmatpush.msra.mxu0 %v309_v4  ;;  %601 = vmatpush.msra.mxu1 %v309_v4  ;;  %vm264_vm9 = vcmp.eq.s32.totalorder %v247_v28, %v1037_v17  ;;  %vm252_vm10 = vcmp.eq.s32.totalorder %v235_v29, %v1037_v17  ;;  %v236_v33 = vadd.s32 24, %v1030_v13  ;;  %v240_v34 = vadd.s32 56, %v1030_v13 }
  0x44   : > { %605 = vmatpush.msra.mxu2 %v308_v5  ;;  %606 = vmatpush.msra.mxu3 %v308_v5  ;;  %vm256_vm11 = vcmp.eq.s32.totalorder %v239_v30, %v1037_v17  ;;  %vm261_vm12 = vcmp.eq.s32.totalorder %v244_v31, %v1037_v17  ;;  %vm265_vm13 = vcmp.eq.s32.totalorder %v248_v32, %v1037_v17 }
  0x45   : > { %319 = vmatpush.msra.mxu0 %v308_v5  ;;  %604 = vmatpush.msra.mxu1 %v308_v5  ;;  %vm253_vm14 = vcmp.eq.s32.totalorder %v236_v33, %v1037_v17  ;;  %vm257_vm15 = vcmp.eq.s32.totalorder %v240_v34, %v1037_v17 }
  0x46   : > { %608 = vmatpush.msra.mxu2 %v307_v6  ;;  %609 = vmatpush.msra.mxu3 %v307_v6 }
  0x47   : > { %320 = vmatpush.msra.mxu0 %v307_v6  ;;  %607 = vmatpush.msra.mxu1 %v307_v6 }
  0x48   : > { %611 = vmatpush.msra.mxu2 %v306_v7  ;;  %612 = vmatpush.msra.mxu3 %v306_v7 }
  0x49   : > { %321 = vmatpush.msra.mxu0 %v306_v7  ;;  %610 = vmatpush.msra.mxu1 %v306_v7 }
  0x4a   : > { %614 = vmatpush.msra.mxu2 %v305_v8  ;;  %615 = vmatpush.msra.mxu3 %v305_v8 }
  0x4b   : > { %322 = vmatpush.msra.mxu0 %v305_v8  ;;  %613 = vmatpush.msra.mxu1 %v305_v8 }
  0x4c   : > { %617 = vmatpush.msra.mxu2 %v304_v9  ;;  %618 = vmatpush.msra.mxu3 %v304_v9 }
  0x4d   : > { %323 = vmatpush.msra.mxu0 %v304_v9  ;;  %616 = vmatpush.msra.mxu1 %v304_v9 }
  0x4e   : > { %620 = vmatpush.msra.mxu2 %v303_v11  ;;  %621 = vmatpush.msra.mxu3 %v303_v11 }
  0x4f   : > { %324 = vmatpush.msra.mxu0 %v303_v11  ;;  %619 = vmatpush.msra.mxu1 %v303_v11 }
  0x50   : > { %623 = vmatpush.msra.mxu2 %v302_v12  ;;  %624 = vmatpush.msra.mxu3 %v302_v12 }
  0x51   : > { %325 = vmatpush.msra.mxu0 %v302_v12  ;;  %622 = vmatpush.msra.mxu1 %v302_v12 }
  0x52   : > { %626 = vmatpush.msra.mxu2 %v301_v14  ;;  %627 = vmatpush.msra.mxu3 %v301_v14 }
  0x53   : > { %326 = vmatpush.msra.mxu0 %v301_v14  ;;  %625 = vmatpush.msra.mxu1 %v301_v14 }
  0x54   : > { %629 = vmatpush.msra.mxu2 %v300_v15  ;;  %630 = vmatpush.msra.mxu3 %v300_v15 }
  0x55   : > { %327 = vmatpush.msra.mxu0 %v300_v15  ;;  %628 = vmatpush.msra.mxu1 %v300_v15 }
  0x56   : > { %632 = vmatpush.msra.mxu2 %v299_v19  ;;  %633 = vmatpush.msra.mxu3 %v299_v19 }
  0x57   : > { %328 = vmatpush.msra.mxu0 %v299_v19  ;;  %631 = vmatpush.msra.mxu1 %v299_v19 }
  0x58   : > { %635 = vmatpush.msra.mxu2 %v298_v21  ;;  %636 = vmatpush.msra.mxu3 %v298_v21 }
  0x59   : > { %572 = vmatmul.msk.f32.vlgmr.msra.gmra.mxu2 %vm258_vm0, %v877_v22  ;;  %576 = vmatmul.msk.f32.vlgmr.msra.gmra.mxu3 %vm262_vm1, %v877_v22 }
  0x5a   : > { %329 = vmatpush.msra.mxu0 %v298_v21  ;;  %634 = vmatpush.msra.mxu1 %v298_v21 }
  0x5b   : > { %564 = vmatmul.msk.f32.vlgmr.msra.gmra.mxu0 %vm250_vm2, %v877_v22  ;;  %568 = vmatmul.msk.f32.vlgmr.msra.gmra.mxu1 %vm254_vm3, %v877_v22 }
  0x61   : > { %573 = vmatmul.msk.f32.gmra.mxu2 %vm259_vm4, %v877_v22  ;;  %577 = vmatmul.msk.f32.gmra.mxu3 %vm263_vm5, %v877_v22 }
  0x63   : > { %565 = vmatmul.msk.f32.gmra.mxu0 %vm251_vm6, %v877_v22  ;;  %569 = vmatmul.msk.f32.gmra.mxu1 %vm255_vm7, %v877_v22 }
  0x69   : > { %574 = vmatmul.msk.f32.gmra.mxu2 %vm260_vm8, %v877_v22  ;;  %578 = vmatmul.msk.f32.gmra.mxu3 %vm264_vm9, %v877_v22 }
  0x6b   : > { %566 = vmatmul.msk.f32.gmra.mxu0 %vm252_vm10, %v877_v22  ;;  %570 = vmatmul.msk.f32.gmra.mxu1 %vm256_vm11, %v877_v22 }
  0x71   : > { %575 = vmatmul.msk.f32.gmra.mxu2 %vm261_vm12, %v877_v22  ;;  %579 = vmatmul.msk.f32.gmra.mxu3 %vm265_vm13, %v877_v22 }
  0x73   : > { %567 = vmatmul.msk.f32.gmra.mxu0 %vm253_vm14, %v877_v22  ;;  %571 = vmatmul.msk.f32.gmra.mxu1 %vm257_vm15, %v877_v22 }
  0xd8   : > { %v331_v35 = vpop.f32.mrf.mxu0  ;;  %v343_v36 = vpop.f32.mrf.mxu1 }
  0xd9   : > { %379 = vst [vmem:[%s1015_s14] sm:$0xff] %v331_v35 }
  0xda   : > { %383 = vst [vmem:[%s1015_s14 + $0x20] sm:$0xff] %v343_v36 }
  0xdc   : > { %v355_v37 = vpop.f32.mrf.mxu2  ;;  %v367_v38 = vpop.f32.mrf.mxu3 }
  0xdd   : > { %387 = vst [vmem:[%s1015_s14 + $0x40] sm:$0xff] %v355_v37 }
  0xde   : > { %391 = vst [vmem:[%s1015_s14 + $0x60] sm:$0xff] %v367_v38 }
  0xe0   : > { %v334_v39 = vpop.f32.mrf.mxu0  ;;  %v346_v40 = vpop.f32.mrf.mxu1 }
  0xe1   : > { %380 = vst [vmem:[%s1015_s14 + $0x8] sm:$0xff] %v334_v39 }
  0xe2   : > { %384 = vst [vmem:[%s1015_s14 + $0x28] sm:$0xff] %v346_v40 }
  0xe4   : > { %v358_v41 = vpop.f32.mrf.mxu2  ;;  %v370_v42 = vpop.f32.mrf.mxu3 }
  0xe5   : > { %388 = vst [vmem:[%s1015_s14 + $0x48] sm:$0xff] %v358_v41 }
  0xe6   : > { %392 = vst [vmem:[%s1015_s14 + $0x68] sm:$0xff] %v370_v42 }
  0xe8   : > { %v337_v43 = vpop.f32.mrf.mxu0  ;;  %v349_v44 = vpop.f32.mrf.mxu1 }
  0xe9   : > { %381 = vst [vmem:[%s1015_s14 + $0x10] sm:$0xff] %v337_v43 }
  0xea   : > { %385 = vst [vmem:[%s1015_s14 + $0x30] sm:$0xff] %v349_v44 }
  0xec   : > { %v361_v45 = vpop.f32.mrf.mxu2  ;;  %v373_v46 = vpop.f32.mrf.mxu3 }
  0xed   : > { %389 = vst [vmem:[%s1015_s14 + $0x50] sm:$0xff] %v361_v45 }
  0xee   : > { %393 = vst [vmem:[%s1015_s14 + $0x70] sm:$0xff] %v373_v46 }
  0xf0   : > { %v340_v47 = vpop.f32.mrf.mxu0  ;;  %v352_v48 = vpop.f32.mrf.mxu1 }
  0xf1   : > { %382 = vst [vmem:[%s1015_s14 + $0x18] sm:$0xff] %v340_v47 }
  0xf2   : > { %386 = vst [vmem:[%s1015_s14 + $0x38] sm:$0xff] %v352_v48 }
  0xf4   : > { %v364_v49 = vpop.f32.mrf.mxu2  ;;  %v376_v50 = vpop.f32.mrf.mxu3 }
  0xf5   : > { %390 = vst [vmem:[%s1015_s14 + $0x58] sm:$0xff] %v364_v49 }
  0xf6   : > { %394 = vst [vmem:[%s1015_s14 + $0x78] sm:$0xff] %v376_v50 }
  0xf7 PF: > { %p581_p5 = scmp.gt.s32.totalorder %s1013_s13, 0 }
  0xf9   : > { %398 = sbr.rel (%p581_p5) target bundleno = 271 (0x10f), region = 44 }
  0xfe   : > { %v878_v51 = vmov 0.0  }
  0xff   : > { %399 = vst [vmem:[%s1015_s14] sm:$0xff] %v878_v51 }
 0x100   : > { %400 = vst [vmem:[%s1015_s14 + $0x8] sm:$0xff] %v878_v51 }
 0x101   : > { %401 = vst [vmem:[%s1015_s14 + $0x10] sm:$0xff] %v878_v51 }
 0x102   : > { %402 = vst [vmem:[%s1015_s14 + $0x18] sm:$0xff] %v878_v51 }
 0x103   : > { %403 = vst [vmem:[%s1015_s14 + $0x20] sm:$0xff] %v878_v51 }
 0x104   : > { %404 = vst [vmem:[%s1015_s14 + $0x28] sm:$0xff] %v878_v51 }
 0x105   : > { %405 = vst [vmem:[%s1015_s14 + $0x30] sm:$0xff] %v878_v51 }
 0x106   : > { %406 = vst [vmem:[%s1015_s14 + $0x38] sm:$0xff] %v878_v51 }
 0x107   : > { %407 = vst [vmem:[%s1015_s14 + $0x40] sm:$0xff] %v878_v51 }
 0x108   : > { %408 = vst [vmem:[%s1015_s14 + $0x48] sm:$0xff] %v878_v51 }
 0x109   : > { %409 = vst [vmem:[%s1015_s14 + $0x50] sm:$0xff] %v878_v51 }
 0x10a   : > { %410 = vst [vmem:[%s1015_s14 + $0x58] sm:$0xff] %v878_v51 }
 0x10b   : > { %411 = vst [vmem:[%s1015_s14 + $0x60] sm:$0xff] %v878_v51 }
 0x10c   : > { %412 = vst [vmem:[%s1015_s14 + $0x68] sm:$0xff] %v878_v51 }
 0x10d   : > { %413 = vst [vmem:[%s1015_s14 + $0x70] sm:$0xff] %v878_v51 }
 0x10e   : > { %414 = vst [vmem:[%s1015_s14 + $0x78] sm:$0xff] %v878_v51 }
 0x10f PF: > { %s588_s27 = sshll.u32 %s864_s19, 7  ;;  %s430_s24 = sshll.u32 %s1015_s14, 4  ;;  %s431_s24 = int_to_ptr.vmem [resolvable:$true] %s430_s24 }
 0x110   : > { %s429_s22 = scalar_lea.hbm %s1147_s3, %s588_s27  ;;  %s416_s26 = scalar_lea.sflag [#allocation6], %s996_s8 }
 0x111   : > { %s432_s25 = sshll.u32 %s429_s22, 4  ;;  %s804_s19 = scalar_lea.hbm %s1147_s3, 256  ;;  %s433_s25 = int_to_ptr.hbm [resolvable:$true] %s432_s25 }
 0x112   : > { %s798_s5 = sshra.s32 %s433_s25, 4  ;;  %s799_s5 = int_to_ptr.hbm [resolvable:$true] %s798_s5 }
 0x113   : > { %s800_s6 = scalar_lea.hbm %s799_s5, 128  ;;  %p805_p10 = scmp.lt.s32.totalorder %s799_s5, %s1147_s3 }
 0x114   : > { %p801_p6 = scmp.ne.s32.totalorder %s799_s5, %s800_s6  ;;  %p806_p13 = scmp.lt.s32.totalorder %s804_s19, %s800_s6 }
 0x116   : > { %p802_p7 = pnand %p801_p6, %p955_p9  ;;  %p807_p0 = por %p806_p13, %p805_p10 }
 0x118   : > { %p803_p8 = pneg %p802_p7 }
 0x11a   : > { %p808_p1 = pnand %p807_p0, %p803_p8 }
 0x11c   : > { %811 = shalt.err (!%p808_p1)
}
 0x11d   : > { %s879_s8 = smov 128   ;;  %s880_s11 = smov 8  }
 0x11e   : > { %641 = dma.vmem_to_hbm [thread:$0]  (%p955_p9), %s431_s24, 2048, %s433_s25, %s416_s26, %s879_s8, %s879_s8, %s880_s11  }
 0x11f PF: > { %s447_s12 = sand.u32 1, %s852_s16   ;;  %p651_p2 = pnand %p539_p12, %p962_p11 }
 0x120   : > { %s448_s13 = scalar_lea.sflag [#allocation6], %s447_s12 }
 0x121   : > { %p652_p3 = pneg %p651_p2 }
 0x123   : > { %847 = dma.done.wait (%p652_p3), %s448_s13, 2048  }
 0x124   : > { %849 = vsyncadd (%p652_p3), %s448_s13, 4294965248  ;;  %s30_s20 = sadd.s32 1, %s872_s20   ;;  %s1153_s16 = smov %s856_s17 }
 0x125   : > { %p27_p4 = scmp.ge.s32.totalorder %s30_s20, 4   ;;  %s1154_s17 = smov %s860_s18 }
 0x126   : > { %s1155_s18 = smov %s960_s29  ;;  %s1156_s19 = smov %s868_s0 }
 0x127   : > { %s1157_s0 = smov %s1159_s23  ;;  %29 = sbr.rel (!%p27_p4) target bundleno = 14 (0xe), region = 94 }
 0x12c   :  { %454 = vsyncpa [#allocation5], 1 }
 0x12d   :  { %456 = vsyncpa [#allocation5 + $0x1], 1 }
 0x12e   :  { %457 = vsyncpa [#allocation8], 1 }
 0x12f   :  { %459 = vsyncpa [#allocation8 + $0x1], 1 }
 0x130   :  { %460 = vsyncpa [#allocation6], 1 }
 0x131   :  { %462 = vsyncpa [#allocation6 + $0x1], 1 }

</bundles_post_ra>
